<compile_context>
chip_gen: v7x
topology: tpu7x:2x2x1
jax: 0.10.0
libtpu: 0.0.40
codegen_flags: <defaults>
</compile_context>

<pallas_src>
import jax
import jax.numpy as jnp
from jax.experimental import pallas as pl
from jax.experimental.pallas import tpu as pltpu

PAD = 128            # padded feature width (lane dimension)
IN_DIM = 2
HID = 100
OUT_DIM = 2
N_LAYERS = 8
MAX_BATCH_TILE = 1024


def _round_up(n, m):
    return ((n + m - 1) // m) * m


def _mlp_kernel(x_ref, w0_ref, b_ref, w_ref, o_ref):
    # x_ref : (bt, 2)        f32   input rows (only 2 lanes, no HBM lane padding)
    # w0_ref: (8, 128)       f32   fc1 W.T in rows 0..1 (rest zero)
    # b_ref : (8, 1, 128)    f32   all biases, zero-padded lanes
    # w_ref : (7, 128, 128)  bf16  fc2..fc8 W.T, zero-padded
    # o_ref : (bt, 2)        f32   only the 2 valid output lanes
    x = x_ref[...]

    # Layer 1 on the VPU: K=2, so the matmul is two broadcasted multiply-adds.
    h = x[:, 0:1] * w0_ref[0:1, :] + x[:, 1:2] * w0_ref[1:2, :] + b_ref[0]
    h = jnp.maximum(h, 0.0)                            # ReLU

    # Layers 2..8 on the MXU: bf16 operands, f32 accumulate, f32 bias (+ReLU).
    for layer in range(1, N_LAYERS):
        hb = h.astype(jnp.bfloat16)
        h = jnp.dot(hb, w_ref[layer - 1],
                    preferred_element_type=jnp.float32) + b_ref[layer]
        if layer < N_LAYERS - 1:
            h = jnp.maximum(h, 0.0)

    o_ref[...] = h[:, :OUT_DIM]                        # narrow (masked) store


def pack_params(params):
    """One-time packing of torch-style (out,in) weights.

    Returns:
      w0_stack: (8, 128)      float32  fc1 W.T in rows 0..1, zero elsewhere.
      b_stack : (8, 1, 128)   float32  all biases, zero-padded lanes.
      w_stack : (7, 128, 128) bfloat16 fc2..fc8 W.T, zero-padded.
    Zero padding is inert: padded weight rows/cols and bias lanes are zero and
    ReLU(0) = 0, so padded lanes stay exactly zero through the network.
    """
    w0_stack = jnp.zeros((8, PAD), jnp.float32)
    b_stack = jnp.zeros((N_LAYERS, 1, PAD), jnp.float32)
    w_stack = jnp.zeros((N_LAYERS - 1, PAD, PAD), jnp.float32)
    for i, (w, b) in enumerate(params):
        out_d, in_d = w.shape
        b_stack = b_stack.at[i, 0, :out_d].set(b)
        if i == 0:
            w0_stack = w0_stack.at[:in_d, :out_d].set(w.T)
        else:
            w_stack = w_stack.at[i - 1, :in_d, :out_d].set(w.T)
    return w0_stack, b_stack, w_stack.astype(jnp.bfloat16)


@jax.jit
def simplenet2_3_forward(x, w0_stack, b_stack, w_stack):
    """x: (B, 2) float32. Other args: output of pack_params."""
    B = x.shape[0]

    # Batch tile: sublane-aligned; for non-tiny batches keep >= 2 grid tiles
    # so both v7x TensorCores are used; cap the tile to amortize per-step
    # overhead without wasting padding.
    if B <= 16:
        bt = max(8, _round_up(B, 8))                   # single tile
    else:
        bt = min(MAX_BATCH_TILE, _round_up((B + 1) // 2, 8))
    b_pad = _round_up(B, bt)
    n_tiles = b_pad // bt

    # Pad rows only (no lane padding in HBM).
    x_pad = x if b_pad == B else jnp.pad(x, ((0, b_pad - B), (0, 0)))

    out = pl.pallas_call(
        _mlp_kernel,
        out_shape=jax.ShapeDtypeStruct((b_pad, OUT_DIM), jnp.float32),
        grid=(n_tiles,),
        in_specs=[
            pl.BlockSpec((bt, IN_DIM), lambda i: (i, 0)),                   # x tile
            pl.BlockSpec((8, PAD), lambda i: (0, 0)),                       # fc1 weights (f32)
            pl.BlockSpec((N_LAYERS, 1, PAD), lambda i: (0, 0, 0)),          # biases
            pl.BlockSpec((N_LAYERS - 1, PAD, PAD), lambda i: (0, 0, 0)),    # fc2..fc8 weights (bf16)
        ],
        out_specs=pl.BlockSpec((bt, OUT_DIM), lambda i: (i, 0)),
        compiler_params=pltpu.CompilerParams(
            dimension_semantics=("parallel",)),
    )(x_pad, w0_stack, b_stack, w_stack)

    return out[:B]                                     # row slice only


def init_params(key):
    """Deterministic torch.nn.Linear-style init: U(-1/sqrt(fan_in), 1/sqrt(fan_in))."""
    dims = [IN_DIM] + [HID] * 7 + [OUT_DIM]
    params = []
    for i in range(N_LAYERS):
        fan_in, fan_out = dims[i], dims[i + 1]
        key, kw, kb = jax.random.split(key, 3)
        bound = 1.0 / (fan_in ** 0.5)
        w = jax.random.uniform(kw, (fan_out, fan_in), jnp.float32, -bound, bound)
        b = jax.random.uniform(kb, (fan_out,), jnp.float32, -bound, bound)
        params.append((w, b))
    return params


def reference_forward_f32(x, params):
    """Full-f32 reference (torch semantics)."""
    h = x
    for i, (w, b) in enumerate(params):
        h = jnp.dot(h, w.T, precision=jax.lax.Precision.HIGHEST) + b
        if i < N_LAYERS - 1:
            h = jnp.maximum(h, 0.0)
    return h


def reference_forward_bf16w(x, params):
    """Reference emulating the kernel's numerics: layer 1 full f32 (VPU path),
    layers 2..8 bf16 weights/activations into the matmul, f32 accumulate."""
    h = x
    for i, (w, b) in enumerate(params):
        if i == 0:
            h = jnp.dot(h, w.T, precision=jax.lax.Precision.HIGHEST) + b
        else:
            wq = w.astype(jnp.bfloat16).astype(jnp.float32)
            hq = h.astype(jnp.bfloat16).astype(jnp.float32)
            h = jnp.dot(hq, wq.T, precision=jax.lax.Precision.HIGHEST) + b
        if i < N_LAYERS - 1:
            h = jnp.maximum(h, 0.0)
    return h


if __name__ == "__main__":
    key = jax.random.PRNGKey(0)
    kx, kp = jax.random.split(key)
    params = init_params(kp)
    x = jax.random.normal(kx, (8, 2), jnp.float32)      # batch=8, in_features=2

    # One-time packing (outside the per-call forward).  For single-sample
    # serving, batch multiple requests into one call: at batch<=8 the kernel
    # is bound by the fixed weight DMA + serial 7-matmul chain.
    w0_stack, b_stack, w_stack = pack_params(params)

    y = simplenet2_3_forward(x, w0_stack, b_stack, w_stack)
    jax.block_until_ready(y)
    assert y.shape == (8, 2)

    # Tight check vs. a reference that uses the same bf16-rounded operands.
    y_q = reference_forward_bf16w(x, params)
    assert jnp.allclose(y, y_q, atol=1e-4, rtol=1e-4), "mismatch vs bf16-weight reference"

    # Loose sanity check vs. the full-f32 torch-equivalent reference
    # (bf16 weight quantization through 7 layers -> small deviation).
    y_f32 = reference_forward_f32(x, params)
    assert jnp.allclose(y, y_f32, atol=2e-2, rtol=2e-2), "mismatch vs f32 reference"

    print("KERNEL_OK")
</pallas_src>

<mosaic_0001>
module attributes {stable_mosaic.version = 11 : i64} {
  func.func @_mlp_kernel(%arg0: i32, %arg1: memref<8x2xf32, #tpu.memory_space<vmem>>, %arg2: memref<8x128xf32, #tpu.memory_space<vmem>>, %arg3: memref<8x1x128xf32, #tpu.memory_space<vmem>>, %arg4: memref<7x128x128xbf16, #tpu.memory_space<vmem>>, %arg5: memref<8x2xf32, #tpu.memory_space<vmem>>) attributes {dimension_semantics = [#tpu.dimension_semantics<parallel>], iteration_bounds = array<i64: 1>, scalar_prefetch = 0 : i64, scratch_operands = 0 : i64, tpu.core_type = #tpu.core_type<tc>, window_params = [{transform_indices = @transform_0, window_bounds = array<i64: 8, 2>}, {pipeline_mode = #tpu.pipeline_mode<synchronous>, transform_indices = @transform_1, window_bounds = array<i64: 8, 128>}, {pipeline_mode = #tpu.pipeline_mode<synchronous>, transform_indices = @transform_2, window_bounds = array<i64: 8, 1, 128>}, {pipeline_mode = #tpu.pipeline_mode<synchronous>, transform_indices = @transform_3, window_bounds = array<i64: 7, 128, 128>}, {transform_indices = @transform_4, window_bounds = array<i64: 8, 2>}]} {
    %c0 = arith.constant 0 : index
    %c0_0 = arith.constant 0 : index
    %0 = vector.load %arg1[%c0, %c0_0] : memref<8x2xf32, #tpu.memory_space<vmem>>, vector<8x2xf32>
    %1 = vector.extract_strided_slice %0 {offsets = [0, 0], sizes = [8, 1], strides = [1, 1]} : vector<8x2xf32> to vector<8x1xf32>
    %c0_1 = arith.constant 0 : index
    %c0_2 = arith.constant 0 : index
    %2 = vector.load %arg2[%c0_1, %c0_2] : memref<8x128xf32, #tpu.memory_space<vmem>>, vector<1x128xf32>
    %3 = vector.broadcast %1 : vector<8x1xf32> to vector<8x128xf32>
    %4 = vector.broadcast %2 : vector<1x128xf32> to vector<8x128xf32>
    %5 = arith.mulf %3, %4 : vector<8x128xf32>
    %6 = vector.extract_strided_slice %0 {offsets = [0, 1], sizes = [8, 1], strides = [1, 1]} : vector<8x2xf32> to vector<8x1xf32>
    %c1 = arith.constant 1 : index
    %c0_3 = arith.constant 0 : index
    %7 = vector.load %arg2[%c1, %c0_3] : memref<8x128xf32, #tpu.memory_space<vmem>>, vector<1x128xf32>
    %8 = vector.broadcast %6 : vector<8x1xf32> to vector<8x128xf32>
    %9 = vector.broadcast %7 : vector<1x128xf32> to vector<8x128xf32>
    %10 = arith.mulf %8, %9 : vector<8x128xf32>
    %11 = arith.addf %5, %10 : vector<8x128xf32>
    %c0_4 = arith.constant 0 : index
    %c0_5 = arith.constant 0 : index
    %c0_6 = arith.constant 0 : index
    %12 = vector.load %arg3[%c0_4, %c0_5, %c0_6] : memref<8x1x128xf32, #tpu.memory_space<vmem>>, vector<1x1x128xf32>
    %13 = vector.shape_cast %12 : vector<1x1x128xf32> to vector<1x128xf32>
    %14 = vector.broadcast %13 : vector<1x128xf32> to vector<8x128xf32>
    %15 = arith.addf %11, %14 : vector<8x128xf32>
    %cst = arith.constant 0.000000e+00 : f32
    %16 = vector.broadcast %cst : f32 to vector<8x128xf32>
    %17 = arith.maximumf %15, %16 : vector<8x128xf32>
    %18 = arith.truncf %17 : vector<8x128xf32> to vector<8x128xbf16>
    %c0_7 = arith.constant 0 : index
    %c0_8 = arith.constant 0 : index
    %c0_9 = arith.constant 0 : index
    %19 = vector.load %arg4[%c0_7, %c0_8, %c0_9] : memref<7x128x128xbf16, #tpu.memory_space<vmem>>, vector<1x128x128xbf16>
    %20 = vector.shape_cast %19 : vector<1x128x128xbf16> to vector<128x128xbf16>
    %cst_10 = arith.constant dense<0.000000e+00> : vector<8x128xf32>
    %21 = tpu.matmul %18, %20, %cst_10 {dimension_numbers = #tpu.dot_dimension_numbers<[1], [0], [0], [1], [0, 0, 1, 1], [], []>} : vector<8x128xbf16>, vector<128x128xbf16>, vector<8x128xf32> -> vector<8x128xf32>
    %c1_11 = arith.constant 1 : index
    %c0_12 = arith.constant 0 : index
    %c0_13 = arith.constant 0 : index
    %22 = vector.load %arg3[%c1_11, %c0_12, %c0_13] : memref<8x1x128xf32, #tpu.memory_space<vmem>>, vector<1x1x128xf32>
    %23 = vector.shape_cast %22 : vector<1x1x128xf32> to vector<1x128xf32>
    %24 = vector.broadcast %23 : vector<1x128xf32> to vector<8x128xf32>
    %25 = arith.addf %21, %24 : vector<8x128xf32>
    %cst_14 = arith.constant 0.000000e+00 : f32
    %26 = vector.broadcast %cst_14 : f32 to vector<8x128xf32>
    %27 = arith.maximumf %25, %26 : vector<8x128xf32>
    %28 = arith.truncf %27 : vector<8x128xf32> to vector<8x128xbf16>
    %c1_15 = arith.constant 1 : index
    %c0_16 = arith.constant 0 : index
    %c0_17 = arith.constant 0 : index
    %29 = vector.load %arg4[%c1_15, %c0_16, %c0_17] : memref<7x128x128xbf16, #tpu.memory_space<vmem>>, vector<1x128x128xbf16>
    %30 = vector.shape_cast %29 : vector<1x128x128xbf16> to vector<128x128xbf16>
    %cst_18 = arith.constant dense<0.000000e+00> : vector<8x128xf32>
    %31 = tpu.matmul %28, %30, %cst_18 {dimension_numbers = #tpu.dot_dimension_numbers<[1], [0], [0], [1], [0, 0, 1, 1], [], []>} : vector<8x128xbf16>, vector<128x128xbf16>, vector<8x128xf32> -> vector<8x128xf32>
    %c2 = arith.constant 2 : index
    %c0_19 = arith.constant 0 : index
    %c0_20 = arith.constant 0 : index
    %32 = vector.load %arg3[%c2, %c0_19, %c0_20] : memref<8x1x128xf32, #tpu.memory_space<vmem>>, vector<1x1x128xf32>
    %33 = vector.shape_cast %32 : vector<1x1x128xf32> to vector<1x128xf32>
    %34 = vector.broadcast %33 : vector<1x128xf32> to vector<8x128xf32>
    %35 = arith.addf %31, %34 : vector<8x128xf32>
    %cst_21 = arith.constant 0.000000e+00 : f32
    %36 = vector.broadcast %cst_21 : f32 to vector<8x128xf32>
    %37 = arith.maximumf %35, %36 : vector<8x128xf32>
    %38 = arith.truncf %37 : vector<8x128xf32> to vector<8x128xbf16>
    %c2_22 = arith.constant 2 : index
    %c0_23 = arith.constant 0 : index
    %c0_24 = arith.constant 0 : index
    %39 = vector.load %arg4[%c2_22, %c0_23, %c0_24] : memref<7x128x128xbf16, #tpu.memory_space<vmem>>, vector<1x128x128xbf16>
    %40 = vector.shape_cast %39 : vector<1x128x128xbf16> to vector<128x128xbf16>
    %cst_25 = arith.constant dense<0.000000e+00> : vector<8x128xf32>
    %41 = tpu.matmul %38, %40, %cst_25 {dimension_numbers = #tpu.dot_dimension_numbers<[1], [0], [0], [1], [0, 0, 1, 1], [], []>} : vector<8x128xbf16>, vector<128x128xbf16>, vector<8x128xf32> -> vector<8x128xf32>
    %c3 = arith.constant 3 : index
    %c0_26 = arith.constant 0 : index
    %c0_27 = arith.constant 0 : index
    %42 = vector.load %arg3[%c3, %c0_26, %c0_27] : memref<8x1x128xf32, #tpu.memory_space<vmem>>, vector<1x1x128xf32>
    %43 = vector.shape_cast %42 : vector<1x1x128xf32> to vector<1x128xf32>
    %44 = vector.broadcast %43 : vector<1x128xf32> to vector<8x128xf32>
    %45 = arith.addf %41, %44 : vector<8x128xf32>
    %cst_28 = arith.constant 0.000000e+00 : f32
    %46 = vector.broadcast %cst_28 : f32 to vector<8x128xf32>
    %47 = arith.maximumf %45, %46 : vector<8x128xf32>
    %48 = arith.truncf %47 : vector<8x128xf32> to vector<8x128xbf16>
    %c3_29 = arith.constant 3 : index
    %c0_30 = arith.constant 0 : index
    %c0_31 = arith.constant 0 : index
    %49 = vector.load %arg4[%c3_29, %c0_30, %c0_31] : memref<7x128x128xbf16, #tpu.memory_space<vmem>>, vector<1x128x128xbf16>
    %50 = vector.shape_cast %49 : vector<1x128x128xbf16> to vector<128x128xbf16>
    %cst_32 = arith.constant dense<0.000000e+00> : vector<8x128xf32>
    %51 = tpu.matmul %48, %50, %cst_32 {dimension_numbers = #tpu.dot_dimension_numbers<[1], [0], [0], [1], [0, 0, 1, 1], [], []>} : vector<8x128xbf16>, vector<128x128xbf16>, vector<8x128xf32> -> vector<8x128xf32>
    %c4 = arith.constant 4 : index
    %c0_33 = arith.constant 0 : index
    %c0_34 = arith.constant 0 : index
    %52 = vector.load %arg3[%c4, %c0_33, %c0_34] : memref<8x1x128xf32, #tpu.memory_space<vmem>>, vector<1x1x128xf32>
    %53 = vector.shape_cast %52 : vector<1x1x128xf32> to vector<1x128xf32>
    %54 = vector.broadcast %53 : vector<1x128xf32> to vector<8x128xf32>
    %55 = arith.addf %51, %54 : vector<8x128xf32>
    %cst_35 = arith.constant 0.000000e+00 : f32
    %56 = vector.broadcast %cst_35 : f32 to vector<8x128xf32>
    %57 = arith.maximumf %55, %56 : vector<8x128xf32>
    %58 = arith.truncf %57 : vector<8x128xf32> to vector<8x128xbf16>
    %c4_36 = arith.constant 4 : index
    %c0_37 = arith.constant 0 : index
    %c0_38 = arith.constant 0 : index
    %59 = vector.load %arg4[%c4_36, %c0_37, %c0_38] : memref<7x128x128xbf16, #tpu.memory_space<vmem>>, vector<1x128x128xbf16>
    %60 = vector.shape_cast %59 : vector<1x128x128xbf16> to vector<128x128xbf16>
    %cst_39 = arith.constant dense<0.000000e+00> : vector<8x128xf32>
    %61 = tpu.matmul %58, %60, %cst_39 {dimension_numbers = #tpu.dot_dimension_numbers<[1], [0], [0], [1], [0, 0, 1, 1], [], []>} : vector<8x128xbf16>, vector<128x128xbf16>, vector<8x128xf32> -> vector<8x128xf32>
    %c5 = arith.constant 5 : index
    %c0_40 = arith.constant 0 : index
    %c0_41 = arith.constant 0 : index
    %62 = vector.load %arg3[%c5, %c0_40, %c0_41] : memref<8x1x128xf32, #tpu.memory_space<vmem>>, vector<1x1x128xf32>
    %63 = vector.shape_cast %62 : vector<1x1x128xf32> to vector<1x128xf32>
    %64 = vector.broadcast %63 : vector<1x128xf32> to vector<8x128xf32>
    %65 = arith.addf %61, %64 : vector<8x128xf32>
    %cst_42 = arith.constant 0.000000e+00 : f32
    %66 = vector.broadcast %cst_42 : f32 to vector<8x128xf32>
    %67 = arith.maximumf %65, %66 : vector<8x128xf32>
    %68 = arith.truncf %67 : vector<8x128xf32> to vector<8x128xbf16>
    %c5_43 = arith.constant 5 : index
    %c0_44 = arith.constant 0 : index
    %c0_45 = arith.constant 0 : index
    %69 = vector.load %arg4[%c5_43, %c0_44, %c0_45] : memref<7x128x128xbf16, #tpu.memory_space<vmem>>, vector<1x128x128xbf16>
    %70 = vector.shape_cast %69 : vector<1x128x128xbf16> to vector<128x128xbf16>
    %cst_46 = arith.constant dense<0.000000e+00> : vector<8x128xf32>
    %71 = tpu.matmul %68, %70, %cst_46 {dimension_numbers = #tpu.dot_dimension_numbers<[1], [0], [0], [1], [0, 0, 1, 1], [], []>} : vector<8x128xbf16>, vector<128x128xbf16>, vector<8x128xf32> -> vector<8x128xf32>
    %c6 = arith.constant 6 : index
    %c0_47 = arith.constant 0 : index
    %c0_48 = arith.constant 0 : index
    %72 = vector.load %arg3[%c6, %c0_47, %c0_48] : memref<8x1x128xf32, #tpu.memory_space<vmem>>, vector<1x1x128xf32>
    %73 = vector.shape_cast %72 : vector<1x1x128xf32> to vector<1x128xf32>
    %74 = vector.broadcast %73 : vector<1x128xf32> to vector<8x128xf32>
    %75 = arith.addf %71, %74 : vector<8x128xf32>
    %cst_49 = arith.constant 0.000000e+00 : f32
    %76 = vector.broadcast %cst_49 : f32 to vector<8x128xf32>
    %77 = arith.maximumf %75, %76 : vector<8x128xf32>
    %78 = arith.truncf %77 : vector<8x128xf32> to vector<8x128xbf16>
    %c6_50 = arith.constant 6 : index
    %c0_51 = arith.constant 0 : index
    %c0_52 = arith.constant 0 : index
    %79 = vector.load %arg4[%c6_50, %c0_51, %c0_52] : memref<7x128x128xbf16, #tpu.memory_space<vmem>>, vector<1x128x128xbf16>
    %80 = vector.shape_cast %79 : vector<1x128x128xbf16> to vector<128x128xbf16>
    %cst_53 = arith.constant dense<0.000000e+00> : vector<8x128xf32>
    %81 = tpu.matmul %78, %80, %cst_53 {dimension_numbers = #tpu.dot_dimension_numbers<[1], [0], [0], [1], [0, 0, 1, 1], [], []>} : vector<8x128xbf16>, vector<128x128xbf16>, vector<8x128xf32> -> vector<8x128xf32>
    %c7 = arith.constant 7 : index
    %c0_54 = arith.constant 0 : index
    %c0_55 = arith.constant 0 : index
    %82 = vector.load %arg3[%c7, %c0_54, %c0_55] : memref<8x1x128xf32, #tpu.memory_space<vmem>>, vector<1x1x128xf32>
    %83 = vector.shape_cast %82 : vector<1x1x128xf32> to vector<1x128xf32>
    %84 = vector.broadcast %83 : vector<1x128xf32> to vector<8x128xf32>
    %85 = arith.addf %81, %84 : vector<8x128xf32>
    %86 = vector.extract_strided_slice %85 {offsets = [0, 0], sizes = [8, 2], strides = [1, 1]} : vector<8x128xf32> to vector<8x2xf32>
    %c0_56 = arith.constant 0 : index
    %c0_57 = arith.constant 0 : index
    %87 = vector.load %arg5[%c0_56, %c0_57] : memref<8x2xf32, #tpu.memory_space<vmem>>, vector<8x2xf32>
    tpu.vector_store %arg5[%c0_56, %c0_57], %86 {strides = array<i32>} : memref<8x2xf32, #tpu.memory_space<vmem>>, vector<8x2xf32>,
    return
  }
  func.func @transform_0(%arg0: i32) -> (i32, i32) {
    %c0_i32 = arith.constant 0 : i32
    %c0_i32_0 = arith.constant 0 : i32
    return %arg0, %c0_i32 : i32, i32
  }
  func.func @transform_1(%arg0: i32) -> (i32, i32) {
    %c0_i32 = arith.constant 0 : i32
    %c0_i32_0 = arith.constant 0 : i32
    %c0_i32_1 = arith.constant 0 : i32
    return %c0_i32, %c0_i32_0 : i32, i32
  }
  func.func @transform_2(%arg0: i32) -> (i32, i32, i32) {
    %c0_i32 = arith.constant 0 : i32
    %c0_i32_0 = arith.constant 0 : i32
    %c0_i32_1 = arith.constant 0 : i32
    %c0_i32_2 = arith.constant 0 : i32
    return %c0_i32, %c0_i32_0, %c0_i32_1 : i32, i32, i32
  }
  func.func @transform_3(%arg0: i32) -> (i32, i32, i32) {
    %c0_i32 = arith.constant 0 : i32
    %c0_i32_0 = arith.constant 0 : i32
    %c0_i32_1 = arith.constant 0 : i32
    %c0_i32_2 = arith.constant 0 : i32
    return %c0_i32, %c0_i32_0, %c0_i32_1 : i32, i32, i32
  }
  func.func @transform_4(%arg0: i32) -> (i32, i32) {
    %c0_i32 = arith.constant 0 : i32
    %c0_i32_0 = arith.constant 0 : i32
    return %arg0, %c0_i32 : i32, i32
  }
}

</mosaic_0001>

<bundles_post_ra>
// kernel: simplenet2_3_forward.1
= control target key start
LH: loop header
LB: loop body
LE: loop exit
PB: predicated region body
PF: predicated region fallthrough
CT: control target
= control target key end

     0   :  { %9 = vsyncpa [#allocation3], 0  ;;  %s1239_s15 = smov [#allocation2]   ;;  %s1389_s0 = inlined_call_operand.vmem [shape: f32[8,2], index: 0, kind: input, shape index: {}]   ;;  %s1390_s1 = inlined_call_operand.vmem [shape: f32[8,128], index: 1, kind: input, shape index: {}]   ;;  %s1391_s2 = inlined_call_operand.vmem [shape: f32[8,1,128], index: 2, kind: input, shape index: {}]   ;;  %s1392_s3 = inlined_call_operand.hbm [shape: bf16[7,128,128], index: 3, kind: input, shape index: {}]   ;;  %s1393_s4 = inlined_call_operand.vmem [shape: f32[8,2], index: 4, kind: output, shape index: {}]  }
   0x1   :  { %s21_s16 = sshll.u32 %s1239_s15, 4  ;;  %s1215_s19 = scalar_lea.hbm %s1392_s3, 7168  ;;  %s22_s16 = int_to_ptr.vmem [resolvable:$true] %s21_s16 }
   0x2   :  { %p1216_p0 = scmp.ne.s32.totalorder %s1392_s3, %s1215_s19  ;;  %p1219_p1 = scmp.lt.u32.totalorder %s1215_s19, %s1392_s3 }
   0x4   :  { %p1221_p2 = pnand %p1219_p1, %p1216_p0 }
   0x6   :  { %1224 = shalt.err (!%p1221_p2)
}
   0x7   :  { %s1225_s24 = scalar_lea.vmem %s22_s16, 7168  ;;  %p1230_p4 = scmp.lt.s32.totalorder %s22_s16, %s22_s16 }
   0x8   :  { %p1226_p3 = scmp.ne.s32.totalorder %s22_s16, %s1225_s24  ;;  %p1231_p5 = scmp.lt.s32.totalorder %s1225_s24, %s1225_s24 }
   0xa   :  { %p1232_p6 = por %p1231_p5, %p1230_p4 }
   0xc   :  { %p1233_p7 = pnand %p1232_p6, %p1226_p3 }
   0xe   :  { %1236 = shalt.err (!%p1233_p7)
}
   0xf   :  { %s1240_s25 = smov 64   ;;  %s1241_s26 = smov 4  }
  0x10   :  { %27 = dma.hbm_to_vmem [thread:$0]  %s1392_s3, 7168, %s22_s16, [#allocation3], %s1240_s25, %s1240_s25, %s1241_s26  }
  0x11   :  { %1237 = dma.done.wait [#allocation3], 7168  }
  0x12   :  { %1238 = vsyncadd [#allocation3], 4294960128  ;;  %v1242_v0 = vmov 0   ;;  %v1243_v1 = vmov 0.0   ;;  %v32_v2 = vld [vmem:[%s1389_s0] sm:$0xff]  ;;  %v1159_v3 = vld [vmem:[#allocation2] sm:$0xff]  }
  0x13   :  { %1157 = vset.pattern.permute.xlu0 %v1242_v0  ;;  %1010 = vmatprep.subr.bf16.mxu0 %v1243_v1  ;;  %v1160_v4 = vld [vmem:[#allocation2 + $0x8] sm:$0xff]   ;;  %v1244_v5 = vmov 1   ;;  %v1161_v6 = vld [vmem:[#allocation2 + $0x10] sm:$0xff]   ;;  %v1162_v7 = vld [vmem:[#allocation2 + $0x18] sm:$0xff]   ;;  %vm1245_vm0 = vmmov 0   ;;  %vm867_vm1 = vcmask 15360  }
  0x14   :  { %1030 = vmatprep.subr.bf16.mxu1 %v1243_v1  ;;  %36 = vperm.xlu0 %1157, %v32_v2   ;;  %v1163_v8 = vld [vmem:[#allocation2 + $0x20] sm:$0xff]   ;;  %v1164_v10 = vld [vmem:[#allocation2 + $0x28] sm:$0xff]   ;;  %v1169_v12 = vld [vmem:[#allocation2 + $0x50] sm:$0xff]  }
  0x15   :  { %1011 = vmatpush3.bf16.msra.mxu0 %v1159_v3  ;;  %1026 = vmatprep.mubr.msk.bf16.mxu0 %vm1245_vm0, %v1243_v1  ;;  %v1167_v9 = vld [vmem:[#allocation2 + $0x40] sm:$0xff]   ;;  %v1168_v11 = vld [vmem:[#allocation2 + $0x48] sm:$0xff]   ;;  %v1165_v13 = vld [vmem:[#allocation2 + $0x30] sm:$0xff]  }
  0x16   :  { %1012 = vmatprep.subr.bf16.mxu0 %v1243_v1  ;;  %1046 = vmatprep.mubr.msk.bf16.mxu1 %vm1245_vm0, %v1243_v1  ;;  %v1170_v14 = vld [vmem:[#allocation2 + $0x58] sm:$0xff]   ;;  %v1171_v16 = vld [vmem:[#allocation2 + $0x60] sm:$0xff]   ;;  %v1172_v17 = vld [vmem:[#allocation2 + $0x68] sm:$0xff]  }
  0x17   :  { %1031 = vmatpush3.bf16.msra.mxu1 %v1167_v9  ;;  %v1166_v15 = vld [vmem:[#allocation2 + $0x38] sm:$0xff]   ;;  %v874_v19 = vld [vmem:[%s1390_s1] ss:$0 sm:$0xff]  ;;  %v875_v20 = vld [vmem:[%s1390_s1 + $0x1] ss:$0 sm:$0xff] }
  0x18   :  { %1158 = vset.pattern.permute.xlu0 %v1244_v5  ;;  %1032 = vmatprep.subr.bf16.mxu1 %v1243_v1  ;;  %v876_v24 = vld [vmem:[%s1391_s2] ss:$0 sm:$0xff]  ;;  %v1174_v30 = vld [vmem:[#allocation2 + $0x78] sm:$0xff]   ;;  %v1175_v31 = vld [vmem:[#allocation2 + $0x80] sm:$0xff]  }
  0x19   :  { %46 = vperm.xlu0 %1158, %v32_v2   ;;  %1013 = vmatpush3.bf16.msra.mxu0 %v1160_v4  ;;  %v1173_v29 = vld [vmem:[#allocation2 + $0x70] sm:$0xff]   ;;  %v1176_v32 = vld [vmem:[#allocation2 + $0x88] sm:$0xff]   ;;  %v1178_v34 = vld [vmem:[#allocation2 + $0x98] sm:$0xff]  }
  0x1a   :  { %1014 = vmatprep.subr.bf16.mxu0 %v1243_v1  ;;  %v1177_v33 = vld [vmem:[#allocation2 + $0x90] sm:$0xff]   ;;  %v1179_v35 = vld [vmem:[#allocation2 + $0xa0] sm:$0xff]   ;;  %v1180_v36 = vld [vmem:[#allocation2 + $0xa8] sm:$0xff]  }
  0x1b   :  { %1033 = vmatpush3.bf16.msra.mxu1 %v1168_v11  ;;  %v878_v37 = vld [vmem:[%s1391_s2 + $0x1] ss:$0 sm:$0xff]  ;;  %v1182_v46 = vld [vmem:[#allocation2 + $0xb8] sm:$0xff]   ;;  %v1183_v47 = vld [vmem:[#allocation2 + $0xc0] sm:$0xff]  }
  0x1c   :  { %1034 = vmatprep.subr.bf16.mxu1 %v1243_v1  ;;  %v1181_v45 = vld [vmem:[#allocation2 + $0xb0] sm:$0xff]   ;;  %v1184_v48 = vld [vmem:[#allocation2 + $0xc8] sm:$0xff]   ;;  %v1186_v50 = vld [vmem:[#allocation2 + $0xd8] sm:$0xff]  }
  0x1d   :  { %1015 = vmatpush3.bf16.msra.mxu0 %v1161_v6  ;;  %v1185_v49 = vld [vmem:[#allocation2 + $0xd0] sm:$0xff]   ;;  %v1187_v51 = vld [vmem:[#allocation2 + $0xe0] sm:$0xff]   ;;  %v1188_v52 = vld [vmem:[#allocation2 + $0xe8] sm:$0xff]  }
  0x1e   :  { %1016 = vmatprep.subr.bf16.mxu0 %v1243_v1  ;;  %v888_v53 = vld [vmem:[%s1391_s2 + $0x2] ss:$0 sm:$0xff]  ;;  %v1190_v62 = vld [vmem:[#allocation2 + $0xf8] sm:$0xff]   ;;  %v1191_v63 = vld [vmem:[#allocation2 + $0x100] sm:$0xff]  }
  0x1f   :  { %1035 = vmatpush3.bf16.msra.mxu1 %v1169_v12  ;;  %v1189_v61 = vld [vmem:[#allocation2 + $0xf0] sm:$0xff]   ;;  %v1192_v0 = vld [vmem:[#allocation2 + $0x108] sm:$0xff]   ;;  %v1194_v3 = vld [vmem:[#allocation2 + $0x118] sm:$0xff]  }
  0x20   :  { %1036 = vmatprep.subr.bf16.mxu1 %v1243_v1  ;;  %v1193_v2 = vld [vmem:[#allocation2 + $0x110] sm:$0xff]   ;;  %v1195_v4 = vld [vmem:[#allocation2 + $0x120] sm:$0xff]   ;;  %v1196_v5 = vld [vmem:[#allocation2 + $0x128] sm:$0xff]  }
  0x21   :  { %1017 = vmatpush3.bf16.msra.mxu0 %v1162_v7  ;;  %v898_v6 = vld [vmem:[%s1391_s2 + $0x3] ss:$0 sm:$0xff] }
  0x22   :  { %1018 = vmatprep.subr.bf16.mxu0 %v1243_v1 }
  0x23   :  { %1037 = vmatpush3.bf16.msra.mxu1 %v1170_v14  ;;  %v1197_v14 = vld [vmem:[#allocation2 + $0x130] sm:$0xff]  }
  0x24   :  { %1038 = vmatprep.subr.bf16.mxu1 %v1243_v1 }
  0x25   :  { %1019 = vmatpush3.bf16.msra.mxu0 %v1163_v8 }
  0x26   :  { %1020 = vmatprep.subr.bf16.mxu0 %v1243_v1 }
  0x27   :  { %1039 = vmatpush3.bf16.msra.mxu1 %v1171_v16  ;;  %v1199_v16 = vld [vmem:[#allocation2 + $0x140] sm:$0xff]  }
  0x28   :  { %1040 = vmatprep.subr.bf16.mxu1 %v1243_v1 }
  0x29   :  { %1021 = vmatpush3.bf16.msra.mxu0 %v1164_v10 }
  0x2a   :  { %1022 = vmatprep.subr.bf16.mxu0 %v1243_v1 }
  0x2b   :  { %1041 = vmatpush3.bf16.msra.mxu1 %v1172_v17  ;;  %v1200_v17 = vld [vmem:[#allocation2 + $0x148] sm:$0xff]  }
  0x2c   :  { %1042 = vmatprep.subr.bf16.mxu1 %v1243_v1 }
  0x2d   :  { %1023 = vmatpush3.bf16.msra.mxu0 %v1165_v13 }
  0x2e   :  { %1024 = vmatprep.subr.bf16.mxu0 %v1243_v1 }
  0x2f   :  { %1043 = vmatpush3.bf16.msra.mxu1 %v1173_v29 }
  0x30   :  { %1044 = vmatprep.subr.bf16.mxu1 %v1243_v1 }
  0x31   :  { %1025 = vmatpush3.bf16.msra.mxu0 %v1166_v15  ;;  %v1198_v15 = vld [vmem:[#allocation2 + $0x138] sm:$0xff]  }
  0x32   :  { %1050 = vmatprep.subr.bf16.mxu0 %v1243_v1 }
  0x33   :  { %1045 = vmatpush3.bf16.msra.mxu1 %v1174_v30  ;;  %v1205_v30 = vld [vmem:[#allocation2 + $0x170] sm:$0xff]  }
  0x34   :  { %1070 = vmatprep.subr.bf16.mxu1 %v1243_v1 }
  0x93   :  { %v37_v18 = vpop.permute.xlu0 %36 }
  0x94   :  { %v43_v22 = vmul.f32 %v874_v19, %v37_v18  ;;  %v1201_v18 = vld [vmem:[#allocation2 + $0x150] sm:$0xff]   ;;  %v1202_v19 = vld [vmem:[#allocation2 + $0x158] sm:$0xff]  }
  0x98   :  { %v47_v21 = vpop.permute.xlu0 %46 }
  0x99   :  { %v53_v23 = vmul.f32 %v875_v20, %v47_v21  ;;  %v1203_v20 = vld [vmem:[#allocation2 + $0x160] sm:$0xff]   ;;  %v1204_v21 = vld [vmem:[#allocation2 + $0x168] sm:$0xff]  }
  0x9b   :  { %v54_v25 = vadd.f32 %v53_v23, %v43_v22  ;;  %v908_v22 = vld [vmem:[%s1391_s2 + $0x4] ss:$0 sm:$0xff] }
  0x9d   :  { %v62_v26 = vadd.f32 %v876_v24, %v54_v25 }
  0x9f   :  { %v63_v27 = vmax.f32 %v62_v26, 0.0 }
  0xa1   :  { %v64_v28 = vpack.c.bf16 %v63_v27, %v63_v27 }
  0xa3   :  { %1027 = vmatmul.mubr.bf16.vlgmr.msra.gmra.mrb[0].mxu0 %v64_v28 }
  0xa4   :  { %1066 = vmatprep.mubr.msk.bf16.mxu0 %vm1245_vm0, %v1243_v1  ;;  %1051 = vmatpush3.bf16.msra.mxu0 %v1175_v31  ;;  %v1206_v31 = vld [vmem:[#allocation2 + $0x178] sm:$0xff]  }
  0xa5   :  { %1052 = vmatprep.subr.bf16.mxu0 %v1243_v1 }
  0xa8   :  { %1053 = vmatpush3.bf16.msra.mxu0 %v1176_v32  ;;  %v1207_v32 = vld [vmem:[#allocation2 + $0x180] sm:$0xff]  }
  0xa9   :  { %1054 = vmatprep.subr.bf16.mxu0 %v1243_v1 }
  0xac   :  { %1055 = vmatpush3.bf16.msra.mxu0 %v1177_v33  ;;  %v1208_v33 = vld [vmem:[#allocation2 + $0x188] sm:$0xff]  }
  0xad   :  { %1056 = vmatprep.subr.bf16.mxu0 %v1243_v1 }
  0xb0   :  { %1057 = vmatpush3.bf16.msra.mxu0 %v1178_v34  ;;  %v1209_v34 = vld [vmem:[#allocation2 + $0x190] sm:$0xff]  }
  0xb1   :  { %1058 = vmatprep.subr.bf16.mxu0 %v1243_v1 }
  0xb4   :  { %1059 = vmatpush3.bf16.msra.mxu0 %v1179_v35  ;;  %v1210_v35 = vld [vmem:[#allocation2 + $0x198] sm:$0xff]  }
  0xb5   :  { %1060 = vmatprep.subr.bf16.mxu0 %v1243_v1 }
  0xb8   :  { %1061 = vmatpush3.bf16.msra.mxu0 %v1180_v36  ;;  %v1211_v36 = vld [vmem:[#allocation2 + $0x1a0] sm:$0xff]  }
  0xb9   :  { %1062 = vmatprep.subr.bf16.mxu0 %v1243_v1 }
  0xbc   :  { %1063 = vmatpush3.bf16.msra.mxu0 %v1181_v45 }
  0xbd   :  { %1064 = vmatprep.subr.bf16.mxu0 %v1243_v1 }
  0xc0   :  { %1065 = vmatpush3.bf16.msra.mxu0 %v1182_v46  ;;  %v1213_v46 = vld [vmem:[#allocation2 + $0x1b0] sm:$0xff]  }
  0xc1   :  { %1090 = vmatprep.subr.bf16.mxu0 %v1243_v1 }
 0x176   :  { %v171_v38 = vpop.f32.mrb[0].mxu0 }
 0x177   :  { %v172_v39 = vadd.f32 %v878_v37, %v171_v38  ;;  %v1028_v40 = vpop.f32.mrb[1].mxu0  ;;  %v1212_v37 = vld [vmem:[#allocation2 + $0x1a8] sm:$0xff]   ;;  %v918_v38 = vld [vmem:[%s1391_s2 + $0x5] ss:$0 sm:$0xff] }
 0x178   :  { %v174_v41 = vpop.f32.mrb[2].mxu0 }
 0x179   :  { %v177_v42 = vmax.f32 %v172_v39, 0.0  ;;  %v1029_v43 = vpop.f32.mrb[3].mxu0 }
 0x17b   :  { %v178_v44 = vpack.c.bf16 %v177_v42, %v177_v42 }
 0x17d   :  { %1047 = vmatmul.mubr.bf16.vlgmr.msra.gmra.mrb[0].mxu1 %v178_v44 }
 0x17e   :  { %1086 = vmatprep.mubr.msk.bf16.mxu1 %vm1245_vm0, %v1243_v1  ;;  %1071 = vmatpush3.bf16.msra.mxu1 %v1183_v47  ;;  %v1214_v47 = vld [vmem:[#allocation2 + $0x1b8] sm:$0xff]  }
 0x17f   :  { %1072 = vmatprep.subr.bf16.mxu1 %v1243_v1 }
 0x182   :  { %1073 = vmatpush3.bf16.msra.mxu1 %v1184_v48  ;;  %v928_v48 = vld [vmem:[%s1391_s2 + $0x6] ss:$0 sm:$0xff] }
 0x183   :  { %1074 = vmatprep.subr.bf16.mxu1 %v1243_v1 }
 0x186   :  { %1075 = vmatpush3.bf16.msra.mxu1 %v1185_v49 }
 0x187   :  { %1076 = vmatprep.subr.bf16.mxu1 %v1243_v1 }
 0x18a   :  { %1077 = vmatpush3.bf16.msra.mxu1 %v1186_v50 }
 0x18b   :  { %1078 = vmatprep.subr.bf16.mxu1 %v1243_v1 }
 0x18e   :  { %1079 = vmatpush3.bf16.msra.mxu1 %v1187_v51 }
 0x18f   :  { %1080 = vmatprep.subr.bf16.mxu1 %v1243_v1 }
 0x192   :  { %1081 = vmatpush3.bf16.msra.mxu1 %v1188_v52 }
 0x193   :  { %1082 = vmatprep.subr.bf16.mxu1 %v1243_v1 }
 0x196   :  { %1083 = vmatpush3.bf16.msra.mxu1 %v1189_v61 }
 0x197   :  { %1084 = vmatprep.subr.bf16.mxu1 %v1243_v1 }
 0x19a   :  { %1085 = vmatpush3.bf16.msra.mxu1 %v1190_v62 }
 0x19b   :  { %1110 = vmatprep.subr.bf16.mxu1 %v1243_v1 }
 0x250   :  { %v286_v54 = vpop.f32.mrb[0].mxu1 }
 0x251   :  { %v287_v55 = vadd.f32 %v888_v53, %v286_v54  ;;  %v1048_v56 = vpop.f32.mrb[1].mxu1 }
 0x252   :  { %v289_v57 = vpop.f32.mrb[2].mxu1  ;;  %v938_v56 = vld [vmem:[%s1391_s2 + $0x7] ss:$0 sm:$0xff] }
 0x253   :  { %v292_v58 = vmax.f32 %v287_v55, 0.0  ;;  %v1049_v59 = vpop.f32.mrb[3].mxu1 }
 0x255   :  { %v293_v60 = vpack.c.bf16 %v292_v58, %v292_v58 }
 0x257   :  { %1067 = vmatmul.mubr.bf16.vlgmr.msra.gmra.mrb[4].mxu0 %v293_v60 }
 0x258   :  { %1106 = vmatprep.mubr.msk.bf16.mxu0 %vm1245_vm0, %v1243_v1  ;;  %1091 = vmatpush3.bf16.msra.mxu0 %v1191_v63 }
 0x259   :  { %1092 = vmatprep.subr.bf16.mxu0 %v1243_v1 }
 0x25c   :  { %1093 = vmatpush3.bf16.msra.mxu0 %v1192_v0 }
 0x25d   :  { %1094 = vmatprep.subr.bf16.mxu0 %v1243_v1 }
 0x260   :  { %1095 = vmatpush3.bf16.msra.mxu0 %v1193_v2 }
 0x261   :  { %1096 = vmatprep.subr.bf16.mxu0 %v1243_v1 }
 0x264   :  { %1097 = vmatpush3.bf16.msra.mxu0 %v1194_v3 }
 0x265   :  { %1098 = vmatprep.subr.bf16.mxu0 %v1243_v1 }
 0x268   :  { %1099 = vmatpush3.bf16.msra.mxu0 %v1195_v4 }
 0x269   :  { %1100 = vmatprep.subr.bf16.mxu0 %v1243_v1 }
 0x26c   :  { %1101 = vmatpush3.bf16.msra.mxu0 %v1196_v5 }
 0x26d   :  { %1102 = vmatprep.subr.bf16.mxu0 %v1243_v1 }
 0x270   :  { %1103 = vmatpush3.bf16.msra.mxu0 %v1197_v14 }
 0x271   :  { %1104 = vmatprep.subr.bf16.mxu0 %v1243_v1 }
 0x274   :  { %1105 = vmatpush3.bf16.msra.mxu0 %v1198_v15 }
 0x275   :  { %1130 = vmatprep.subr.bf16.mxu0 %v1243_v1 }
 0x32a   :  { %v401_v7 = vpop.f32.mrb[4].mxu0 }
 0x32b   :  { %v402_v8 = vadd.f32 %v898_v6, %v401_v7  ;;  %v1068_v9 = vpop.f32.mrb[5].mxu0 }
 0x32c   :  { %v404_v10 = vpop.f32.mrb[6].mxu0 }
 0x32d   :  { %v407_v11 = vmax.f32 %v402_v8, 0.0  ;;  %v1069_v12 = vpop.f32.mrb[7].mxu0 }
 0x32f   :  { %v408_v13 = vpack.c.bf16 %v407_v11, %v407_v11 }
 0x331   :  { %1087 = vmatmul.mubr.bf16.vlgmr.msra.gmra.mrb[4].mxu1 %v408_v13 }
 0x332   :  { %1126 = vmatprep.mubr.msk.bf16.mxu1 %vm1245_vm0, %v1243_v1  ;;  %1111 = vmatpush3.bf16.msra.mxu1 %v1199_v16 }
 0x333   :  { %1112 = vmatprep.subr.bf16.mxu1 %v1243_v1 }
 0x336   :  { %1113 = vmatpush3.bf16.msra.mxu1 %v1200_v17 }
 0x337   :  { %1114 = vmatprep.subr.bf16.mxu1 %v1243_v1 }
 0x33a   :  { %1115 = vmatpush3.bf16.msra.mxu1 %v1201_v18 }
 0x33b   :  { %1116 = vmatprep.subr.bf16.mxu1 %v1243_v1 }
 0x33e   :  { %1117 = vmatpush3.bf16.msra.mxu1 %v1202_v19 }
 0x33f   :  { %1118 = vmatprep.subr.bf16.mxu1 %v1243_v1 }
 0x342   :  { %1119 = vmatpush3.bf16.msra.mxu1 %v1203_v20 }
 0x343   :  { %1120 = vmatprep.subr.bf16.mxu1 %v1243_v1 }
 0x346   :  { %1121 = vmatpush3.bf16.msra.mxu1 %v1204_v21 }
 0x347   :  { %1122 = vmatprep.subr.bf16.mxu1 %v1243_v1 }
 0x34a   :  { %1123 = vmatpush3.bf16.msra.mxu1 %v1205_v30 }
 0x34b   :  { %1124 = vmatprep.subr.bf16.mxu1 %v1243_v1 }
 0x34e   :  { %1125 = vmatpush3.bf16.msra.mxu1 %v1206_v31 }
 0x404   :  { %v516_v23 = vpop.f32.mrb[4].mxu1 }
 0x405   :  { %v517_v24 = vadd.f32 %v908_v22, %v516_v23  ;;  %v1088_v25 = vpop.f32.mrb[5].mxu1 }
 0x406   :  { %v519_v26 = vpop.f32.mrb[6].mxu1 }
 0x407   :  { %v522_v27 = vmax.f32 %v517_v24, 0.0  ;;  %v1089_v28 = vpop.f32.mrb[7].mxu1 }
 0x409   :  { %v523_v29 = vpack.c.bf16 %v522_v27, %v522_v27 }
 0x40b   :  { %1107 = vmatmul.mubr.bf16.vlgmr.msra.gmra.mrb[8].mxu0 %v523_v29 }
 0x40c   :  { %1146 = vmatprep.mubr.msk.bf16.mxu0 %vm1245_vm0, %v1243_v1  ;;  %1131 = vmatpush3.bf16.msra.mxu0 %v1207_v32 }
 0x40d   :  { %1132 = vmatprep.subr.bf16.mxu0 %v1243_v1 }
 0x410   :  { %1133 = vmatpush3.bf16.msra.mxu0 %v1208_v33 }
 0x411   :  { %1134 = vmatprep.subr.bf16.mxu0 %v1243_v1 }
 0x414   :  { %1135 = vmatpush3.bf16.msra.mxu0 %v1209_v34 }
 0x415   :  { %1136 = vmatprep.subr.bf16.mxu0 %v1243_v1 }
 0x418   :  { %1137 = vmatpush3.bf16.msra.mxu0 %v1210_v35 }
 0x419   :  { %1138 = vmatprep.subr.bf16.mxu0 %v1243_v1 }
 0x41c   :  { %1139 = vmatpush3.bf16.msra.mxu0 %v1211_v36 }
 0x41d   :  { %1140 = vmatprep.subr.bf16.mxu0 %v1243_v1 }
 0x420   :  { %1141 = vmatpush3.bf16.msra.mxu0 %v1212_v37 }
 0x421   :  { %1142 = vmatprep.subr.bf16.mxu0 %v1243_v1 }
 0x424   :  { %1143 = vmatpush3.bf16.msra.mxu0 %v1213_v46 }
 0x425   :  { %1144 = vmatprep.subr.bf16.mxu0 %v1243_v1 }
 0x428   :  { %1145 = vmatpush3.bf16.msra.mxu0 %v1214_v47 }
 0x4de   :  { %v631_v39 = vpop.f32.mrb[8].mxu0 }
 0x4df   :  { %v632_v40 = vadd.f32 %v918_v38, %v631_v39  ;;  %v1108_v41 = vpop.f32.mrb[9].mxu0 }
 0x4e0   :  { %v634_v42 = vpop.f32.mrb[10].mxu0 }
 0x4e1   :  { %v637_v43 = vmax.f32 %v632_v40, 0.0  ;;  %v1109_v44 = vpop.f32.mrb[11].mxu0 }
 0x4e3   :  { %v638_v45 = vpack.c.bf16 %v637_v43, %v637_v43 }
 0x4e5   :  { %1127 = vmatmul.mubr.bf16.vlgmr.msra.gmra.mrb[8].mxu1 %v638_v45 }
 0x5b8   :  { %v746_v49 = vpop.f32.mrb[8].mxu1 }
 0x5b9   :  { %v747_v50 = vadd.f32 %v928_v48, %v746_v49  ;;  %v1128_v51 = vpop.f32.mrb[9].mxu1 }
 0x5ba   :  { %v749_v52 = vpop.f32.mrb[10].mxu1 }
 0x5bb   :  { %v752_v53 = vmax.f32 %v747_v50, 0.0  ;;  %v1129_v54 = vpop.f32.mrb[11].mxu1 }
 0x5bd   :  { %v753_v55 = vpack.c.bf16 %v752_v53, %v752_v53 }
 0x5bf   :  { %1147 = vmatmul.mubr.bf16.vlgmr.msra.gmra.mrb[12].mxu0 %v753_v55 }
 0x692   :  { %v861_v57 = vpop.f32.mrb[12].mxu0 }
 0x693   :  { %v862_v1 = vadd.f32 %v938_v56, %v861_v57  ;;  %v1148_v58 = vpop.f32.mrb[13].mxu0 }
 0x694   :  { %v864_v59 = vpop.f32.mrb[14].mxu0 }
 0x695   :  { %868 = vst.msk [vmem:[%s1393_s4] sm:$0xff] %vm867_vm1, %v862_v1  ;;  %v1149_v60 = vpop.f32.mrb[15].mxu0 }
 0x696   :  { %873 = vsyncpa [#allocation3], 1 }

</bundles_post_ra>
